<compile_context>
chip_gen: v5e
topology: v5e:2x2
jax: 0.10.0
libtpu: 0.0.40
codegen_flags: <defaults>
</compile_context>

<pallas_src>
import numpy as np

import jax
import jax.numpy as jnp
from jax.experimental import pallas as pl
from jax.experimental.pallas import tpu as pltpu

EXPANSION = 4                # torchvision Bottleneck expansion
COMPUTE_DT = jnp.bfloat16    # MXU operand dtype (accumulation stays f32)


def _roll_matches_numpy():
    """Probe pltpu.roll direction once (eagerly, on the same default TPU
    backend the forward runs on): True iff it matches np.roll/jnp.roll
    semantics (out[i] = x[(i - shift) % n])."""
    def k(x_ref, o_ref):
        o_ref[...] = pltpu.roll(x_ref[...], 1, 1)

    x = jnp.arange(256, dtype=jnp.float32).reshape(1, 256)
    y = pl.pallas_call(k, out_shape=jax.ShapeDtypeStruct((1, 256), jnp.float32))(x)
    return bool(jax.device_get(y)[0, 0] == 255.0)


def build_params(key, n_channels, n_config, layers, planes, groups,
                 width_per_group):
    """Deterministic parameters.  Eval-mode BatchNorm with fresh-init stats
    (gamma=1, beta=0, mean=0, var=1) is an identity affine and is already
    folded: weights unchanged, every conv gets a zero bias.  The Refiner's
    final Conv2d(n_channels, 1, 1) is folded into each stage head."""
    c_stem = planes[0]
    width = groups * width_per_group
    cg = width // groups

    def nrm(k, shape, scale=0.1):
        return jax.random.normal(k, shape, jnp.float32) * scale

    def zbias(c):
        return jnp.zeros((c, 1), jnp.float32)

    key, k = jax.random.split(key)
    # stem: 3x3 conv over (input_w ++ config) channels, per tap (9, c_out, c_in)
    w_stem = nrm(k, (3, 3, 1 + n_config, c_stem))
    w_stem = jnp.transpose(w_stem, (0, 1, 3, 2)).reshape(9, c_stem, 1 + n_config)

    kparams = {"stem_w_x": w_stem[:, :, :1]}      # (9, c_stem, 1) f32 -> VPU path
    stem_w_cfg = w_stem[:, :, 1:]                 # (9, c_stem, n_config), wrapper-side
    stem_b = jnp.zeros((c_stem,), jnp.float32)    # BN-folded stem bias (identity -> 0)

    key, kc, kb = jax.random.split(key, 3)
    conv_w = nrm(kc, (1, n_channels))             # Refiner's Conv2d(n_ch, 1, 1)
    conv_b = nrm(kb, (1, 1), 0.01)

    inplanes = c_stem
    stages = []
    for nblocks, pln in zip(layers, planes):
        blocks = []
        for _ in range(nblocks):
            cout = pln * EXPANSION
            key, k1, k2, k3, kd = jax.random.split(key, 5)
            # grouped 3x3 -> ONE block-diagonal (width, 9*width) weight acting
            # on the stacked-tap operand (lane-dense, zeros free on the MXU).
            wg = np.asarray(nrm(k2, (groups, 3, 3, cg, cg)))
            w2 = np.zeros((width, 9 * width), np.float32)
            for g in range(groups):
                for t in range(9):
                    w2[g * cg:(g + 1) * cg,
                       t * width + g * cg: t * width + (g + 1) * cg] = wg[g, t // 3, t % 3]
            blk = {
                "w1": nrm(k1, (width, inplanes)).astype(COMPUTE_DT),
                "b1": zbias(width),
                "w2": jnp.asarray(w2).astype(COMPUTE_DT),
                "b2": zbias(width),
                "w3": nrm(k3, (cout, width)).astype(COMPUTE_DT),
                "b3": zbias(cout),
            }
            if inplanes != cout:
                blk["wd"] = nrm(kd, (cout, inplanes)).astype(COMPUTE_DT)
                blk["bd"] = zbias(cout)
            blocks.append(blk)
            inplanes = cout
        key, kh = jax.random.split(key)
        head_w = nrm(kh, (n_channels, inplanes))           # per-stage head 1x1 conv
        head_b = jnp.zeros((n_channels, 1), jnp.float32)
        stages.append({
            "blocks": blocks,
            # fold Refiner's Conv2d(n_channels,1,1) + bias into the head:
            "head": {"w": (conv_w @ head_w).astype(COMPUTE_DT),  # (1, inplanes)
                     "b": conv_w @ head_b + conv_b},             # (1, 1) f32
        })
    kparams["stages"] = stages
    return {"kernel": kparams, "stem_w_cfg": stem_w_cfg, "stem_b": stem_b}


def make_refiner_forward(params, *, num_mels, length, batch_tile, roll_like_np):
    """Builds forward(inp, config) -> list of (B, num_mels, length) arrays."""
    H, W = num_mels, length
    M = H * W
    L = batch_tile * M                      # lane extent per grid step
    kparams = params["kernel"]
    stem_w_cfg = params["stem_w_cfg"]       # (9, c_stem, n_config)
    stem_b = params["stem_b"]               # (c_stem,)
    flat_w, treedef = jax.tree_util.tree_flatten(kparams)
    n_w = len(flat_w)
    n_stages = len(kparams["stages"])
    c_stem = kparams["stem_w_x"].shape[1]

    # static 3x3 tap bookkeeping: tap t <-> (dy, dx) = (t//3 - 1, t%3 - 1)
    taps = [(t // 3 - 1, t % 3 - 1) for t in range(9)]
    shifts = []
    for dy, dx in taps:
        s = dy * W + dx                     # want tap[m] = x[m + s]
        shifts.append(((-s) % L) if roll_like_np else (s % L))

    # Per-tap validity masks, tiled once per image along the lane axis.
    # They zero the spatial zero-padding AND (since |dy|,|dx| <= 1 < W) the
    # roll wrap-around at image seams, which makes the batch-in-lanes fold
    # exact; shared by every 3x3 conv in the net.
    hh, ww = np.divmod(np.arange(M), W)
    masks_img = np.stack(
        [((hh + dy >= 0) & (hh + dy < H) & (ww + dx >= 0) & (ww + dx < W))
         for dy, dx in taps]).astype(np.float32)                    # (9, M)
    masks_const = jnp.asarray(np.tile(masks_img, (1, batch_tile)).reshape(9, 1, L))
    masks_img_j = jnp.asarray(masks_img)

    def kernel(x_ref, cfg_ref, mask_ref, *rest):
        w_refs, out_refs = rest[:n_w], rest[n_w:]
        p = jax.tree_util.tree_unflatten(treedef, list(w_refs))

        x_in = x_ref[0]                               # (1, L) f32
        masks = [mask_ref[t] for t in range(9)]       # 9 x (1, L) f32

        def tap(x, t):
            if taps[t] == (0, 0):
                return x
            return pltpu.roll(x, shifts[t], 1) * masks[t]

        def tap_stack(x):
            # 9 shifted+masked copies stacked along K -> one MXU matmul later.
            return jnp.concatenate([tap(x, t) for t in range(9)], axis=0)

        def mm(w, v):                                 # (N, K) @ (K, L) on MXU
            if v.dtype != COMPUTE_DT:
                v = v.astype(COMPUTE_DT)              # single hoisted cast
            return jnp.dot(w, v, preferred_element_type=jnp.float32)

        # --- stem: 3x3 conv over [input_w ; broadcast(config)].  The config
        #     part (+ stem bias) is pre-folded wrapper-side into cfg_ref; the
        #     1-channel input part is a VPU broadcast multiply per tap. ---
        acc = cfg_ref[0]                              # (c_stem, L) f32
        for t in range(9):
            acc = acc + p["stem_w_x"][t] * tap(x_in, t)
        act = jnp.maximum(acc, 0.0)

        def bottleneck(x, blk):
            xb = x.astype(COMPUTE_DT)                 # shared by w1 and wd
            o = jnp.maximum(mm(blk["w1"][...], xb) + blk["b1"][...], 0.0)
            # grouped 3x3: ONE matmul over the stacked-tap operand
            o = jnp.maximum(mm(blk["w2"][...], tap_stack(o)) + blk["b2"][...], 0.0)
            if "wd" in blk:
                ident = mm(blk["wd"][...], xb) + blk["bd"][...]
            else:
                ident = x
            return jnp.maximum(mm(blk["w3"][...], o) + blk["b3"][...] + ident, 0.0)

        for si, stage in enumerate(p["stages"]):
            for blk in stage["blocks"]:
                act = bottleneck(act, blk)
            # head with Refiner's final 1x1 conv + bias folded in, + residual
            out_refs[si][0] = (mm(stage["head"]["w"][...], act)
                               + stage["head"]["b"][...] + x_in)

    def _const_spec(shape):
        nd = len(shape)
        return pl.BlockSpec(shape, lambda b, _nd=nd: (0,) * _nd)

    def forward(inp, config):
        B = inp.shape[0]
        assert inp.shape[1:] == (H, W)
        assert B % batch_tile == 0
        n_tiles = B // batch_tile
        # batch folded into lanes: image b_local occupies lanes [b_local*M, ...)
        x = inp.reshape(n_tiles, 1, L)

        # fold config x stem-weights x padding-masks (+ stem bias) into one
        # lane-dense per-image (c_stem, M) bias block (never materializes the
        # (B, n_config, H, W) broadcast + concat of the reference).
        cfg_tap = jnp.einsum("bk,tok->bto", config, stem_w_cfg)      # (B, 9, c_stem)
        cfg_bias = jnp.einsum("bto,tm->bom", cfg_tap, masks_img_j)   # (B, c_stem, M)
        cfg_bias = cfg_bias + stem_b[None, :, None]
        cfg_bias = cfg_bias.reshape(n_tiles, batch_tile, c_stem, M)
        cfg_bias = jnp.transpose(cfg_bias, (0, 2, 1, 3)).reshape(n_tiles, c_stem, L)

        in_specs = ([pl.BlockSpec((1, 1, L), lambda b: (b, 0, 0)),
                     pl.BlockSpec((1, c_stem, L), lambda b: (b, 0, 0)),
                     _const_spec((9, 1, L))]
                    + [_const_spec(w.shape) for w in flat_w])
        out_shape = tuple(jax.ShapeDtypeStruct((n_tiles, 1, L), jnp.float32)
                          for _ in range(n_stages))
        out_specs = tuple(pl.BlockSpec((1, 1, L), lambda b: (b, 0, 0))
                          for _ in range(n_stages))

        outs = pl.pallas_call(
            kernel,
            out_shape=out_shape,
            grid_spec=pltpu.PrefetchScalarGridSpec(
                num_scalar_prefetch=0,
                grid=(n_tiles,),
                in_specs=in_specs,
                out_specs=out_specs,
            ),
            compiler_params=pltpu.CompilerParams(
                dimension_semantics=("parallel",),
                vmem_limit_bytes=32 * 1024 * 1024),
        )(x, cfg_bias, masks_const, *flat_w)
        return [o.reshape(B, H, W) for o in outs]

    return forward


if __name__ == "__main__":
    n_channels = 1
    n_config = 3
    batch, num_mels, length = 4, 16, 16
    # batch_tile=2 -> grid=(2,) "parallel": 512 lanes per step (lane-dense
    # stores, amortized weight pushes) while keeping both v7x TCs busy.
    batch_tile = 2
    layers, planes = [1, 1], [8, 8]
    groups, width_per_group = 2, 4

    key = jax.random.PRNGKey(0)
    key, k_in, k_cfg, k_par = jax.random.split(key, 4)
    inp = jax.random.normal(k_in, (batch, num_mels, length), jnp.float32)
    cfg = jax.random.normal(k_cfg, (batch, n_config), jnp.float32)

    params = build_params(k_par, n_channels, n_config, layers, planes,
                          groups, width_per_group)

    forward = make_refiner_forward(
        params, num_mels=num_mels, length=length, batch_tile=batch_tile,
        roll_like_np=_roll_matches_numpy())
    fwd = jax.jit(forward)

    outs = jax.block_until_ready(fwd(inp, cfg))
    for o in outs:
        assert o.shape == inp.shape, (o.shape, inp.shape)
        assert bool(jnp.all(jnp.isfinite(o)))
    print("KERNEL_OK")
</pallas_src>

<mosaic_0001>
module attributes {stable_mosaic.version = 11 : i64} {
  func.func @k(%arg0: memref<1x256xf32, #tpu.memory_space<vmem>>, %arg1: memref<1x256xf32, #tpu.memory_space<vmem>>) attributes {dimension_semantics = [], scalar_prefetch = 0 : i64, scratch_operands = 0 : i64, tpu.core_type = #tpu.core_type<tc>} {
    %c0 = arith.constant 0 : index
    %c0_0 = arith.constant 0 : index
    %0 = vector.load %arg0[%c0, %c0_0] : memref<1x256xf32, #tpu.memory_space<vmem>>, vector<1x256xf32>
    %c1_i32 = arith.constant 1 : i32
    %1 = tpu.dynamic_rotate %0 by %c1_i32 dim 1 : vector<1x256xf32>, i32 -> vector<1x256xf32>
    %c0_1 = arith.constant 0 : index
    %c0_2 = arith.constant 0 : index
    %2 = vector.load %arg1[%c0_1, %c0_2] : memref<1x256xf32, #tpu.memory_space<vmem>>, vector<1x256xf32>
    tpu.vector_store %arg1[%c0_1, %c0_2], %1 {strides = array<i32>} : memref<1x256xf32, #tpu.memory_space<vmem>>, vector<1x256xf32>,
    return
  }
}

</mosaic_0001>

<bundles_post_ra>
// kernel: tpu_custom_call.1
= control target key start
LH: loop header
LB: loop body
LE: loop exit
PB: predicated region body
PF: predicated region fallthrough
CT: control target
= control target key end

     0   :  { %6 = vsyncpa [#allocation3], 0  ;;  %s140_s0 = inlined_call_operand.hbm [shape: f32[1,256], index: 0, kind: input, shape index: {}]   ;;  %s141_s1 = inlined_call_operand.hbm [shape: f32[1,256], index: 1, kind: output, shape index: {}]  }
   0x1   :  { %7 = vsyncpa [#allocation4], 0  ;;  %s13_s8 = sshll.u32 %s140_s0, 4  ;;  %s121_s9 = smov [#allocation2]   ;;  %s14_s8 = int_to_ptr.hbm [resolvable:$true] %s13_s8 }
   0x2   :  { %s15_s10 = sshll.u32 %s121_s9, 4  ;;  %s16_s10 = int_to_ptr.vmem [resolvable:$true] %s15_s10 }
   0x3   :  { %18 = dma.hbm_to_vmem [thread:$0]  %s14_s8, 32, %s16_s10, [#allocation3]  }
   0x4   :  { %117 = dma.done.wait [#allocation3], 32  }
   0x5   :  { %118 = vsyncadd [#allocation3], 4294967264  ;;  %v23_v0 = vld [vmem:[#allocation2] sm:$0x3]  ;;  %s122_s11 = smov 1   ;;  %v33_v3 = vlaneseq  ;;  %s123_s12 = smov [#allocation5]  }
   0x6   :  { %v25_v1 = vperm.slane %v23_v0, 0  ;;  %v26_v2 = vperm.slane %v23_v0, 1  ;;  %s54_s0 = sshll.u32 %s123_s12, 4  ;;  %s56_s15 = sshll.u32 %s141_s1, 4  ;;  %vm41_vm1 = vcmask 1040384   ;;  %s55_s0 = int_to_ptr.vmem [resolvable:$true] %s54_s0  ;;  %s57_s15 = int_to_ptr.hbm [resolvable:$true] %s56_s15 }
   0x7   :  { %v34_v5 = vand.u32 127, %v33_v3  ;;  %vm46_vm2 = vcmp.lt.s32.totalorder %v33_v3, 256 }
   0x8   :  { %29 = vrot.lane.b32.xlu0 %v25_v1, %s122_s11 }
   0x9   :  { %vm35_vm0 = vcmp.lt.s32.totalorder %v34_v5, 1 }
  0x10   :  { %31 = vrot.lane.b32.xlu0 %v26_v2, %s122_s11 }
  0x7a   :  { %v30_v4 = vpop.permute.xlu0 %29 }
  0x82   :  { %v32_v6 = vpop.permute.xlu0 %31 }
  0x83   :  { %v36_v7 = vsel %vm35_vm0, %v30_v4, %v32_v6  ;;  %v37_v9 = vsel %vm35_vm0, %v32_v6, %v30_v4 }
  0x84   :  { %v40_v8 = vrot.slane %v36_v7, 7 }
  0x86   :  { %v42_v10 = vsel %vm41_vm1, %v37_v9, %v40_v8 }
  0x87   :  { %48 = vst.msk [vmem:[#allocation5] sm:$0x3] %vm46_vm2, %v42_v10 }
  0x88   :  { %59 = dma.vmem_to_hbm [thread:$0]  %s55_s0, 32, %s57_s15, [#allocation4]  }
  0x89   :  { %119 = dma.done.wait [#allocation4], 32  }
  0x8a   :  { %120 = vsyncadd [#allocation4], 4294967264 }
  0x8b   :  { %64 = vsyncpa [#allocation3], 1 }
  0x8c   :  { %65 = vsyncpa [#allocation4], 1 }

</bundles_post_ra>
